<compile_context>
chip_gen: v7x
topology: tpu7x:2x2x1
jax: 0.10.0
libtpu: 0.0.40
codegen_flags: <defaults>
</compile_context>

<pallas_src>
import functools

import jax
import jax.numpy as jnp
from jax.experimental import pallas as pl
from jax.experimental.pallas import tpu as pltpu


# ------------------------------- helpers --------------------------------------
def _round_up(v, m):
    return ((v + m - 1) // m) * m


def _pick_row_tile(m):
    # Prefer large row tiles but keep >= 2 row blocks when possible so the "parallel"
    # i axis actually splits across v7x's two TensorCores (j grid is 1 in this model).
    for c in (512, 256, 128):
        if m % c == 0 and m // c >= 2:
            return c
    return 128 if m % 128 == 0 else m


def _pick_tile(dim, candidates):
    for c in candidates:
        if dim % c == 0:
            return c
    return dim  # dims are multiples of 128 by construction


_VMEM_LIMIT_CACHE = [None]


def _vmem_limit_bytes():
    """Per-generation scoped-VMEM budget (v5e/v6e: 128 MiB phys, v7x: 64 MiB per TC)."""
    if _VMEM_LIMIT_CACHE[0] is not None:
        return _VMEM_LIMIT_CACHE[0]
    limit = 32 * 1024 * 1024
    try:
        kind = jax.devices()[0].device_kind.lower()
        if "v7" in kind:
            limit = 48 * 1024 * 1024
        elif "v5" in kind or "v6" in kind:
            limit = 100 * 1024 * 1024
    except Exception:
        pass
    _VMEM_LIMIT_CACHE[0] = limit
    return limit


# -------------------------- support matmul kernel ------------------------------
def _matmul_kernel(a_ref, b_ref, o_ref, acc_ref):
    """out = a @ b with f32 VMEM accumulation (no bias, no activation)."""
    k = pl.program_id(2)

    @pl.when(k == 0)
    def _():
        acc_ref[...] = jnp.zeros_like(acc_ref)

    acc_ref[...] += jnp.dot(a_ref[...], b_ref[...],
                            preferred_element_type=jnp.float32)

    @pl.when(k == pl.num_programs(2) - 1)
    def _():
        o_ref[...] = acc_ref[...].astype(o_ref.dtype)


def _support_matmul(a, b, *, out_dtype):
    """a @ b; a:[M,K], b:[K,N]; all dims multiples of 128."""
    M, K = a.shape
    K2, N = b.shape
    assert K == K2

    tm = _pick_row_tile(M)
    tn = _pick_tile(N, (512, 256, 128))
    tk = _pick_tile(K, (512, 256, 128))
    grid = (M // tm, N // tn, K // tk)

    cost = pl.CostEstimate(
        flops=2 * M * N * K,
        transcendentals=0,
        bytes_accessed=int(a.size * a.dtype.itemsize + b.size * b.dtype.itemsize
                           + M * N * jnp.dtype(out_dtype).itemsize),
    )

    return pl.pallas_call(
        _matmul_kernel,
        out_shape=jax.ShapeDtypeStruct((M, N), out_dtype),
        grid_spec=pltpu.PrefetchScalarGridSpec(
            num_scalar_prefetch=0,
            grid=grid,
            in_specs=[
                pl.BlockSpec((tm, tk), lambda i, j, k: (i, k)),
                pl.BlockSpec((tk, tn), lambda i, j, k: (k, j)),
            ],
            out_specs=pl.BlockSpec((tm, tn), lambda i, j, k: (i, j)),
            scratch_shapes=[pltpu.VMEM((tm, tn), jnp.float32)],
        ),
        compiler_params=pltpu.CompilerParams(
            dimension_semantics=("parallel", "parallel", "arbitrary"),
            vmem_limit_bytes=_vmem_limit_bytes(),
        ),
        cost_estimate=cost,
    )(a, b)


# ------------------------- aggregation (adj @ S) kernel ------------------------
def _agg_kernel(adj_ref, s_ref, bias_ref, *rest, tk, rhs_resident, fuse_next):
    """out = relu(adj @ S + bias) [@ W_next], S (and W_next) resident in VMEM."""
    if fuse_next:
        w_next_ref, o_ref, acc_ref = rest
    else:
        o_ref, acc_ref = rest

    k = pl.program_id(1)

    @pl.when(k == 0)
    def _():
        acc_ref[...] = jnp.zeros_like(acc_ref)

    if rhs_resident:
        ks = pl.multiple_of(k * tk, tk)
        s_blk = s_ref[pl.ds(ks, tk), :]   # slice the resident support matrix
    else:
        s_blk = s_ref[...]                # streamed (tk, N) block

    acc_ref[...] += jnp.dot(adj_ref[...], s_blk,
                            preferred_element_type=jnp.float32)

    @pl.when(k == pl.num_programs(1) - 1)
    def _():
        h = jnp.maximum(acc_ref[...] + bias_ref[...], 0.0)   # f32 epilogue
        if fuse_next:
            out = jnp.dot(h.astype(w_next_ref.dtype), w_next_ref[...],
                          preferred_element_type=jnp.float32)
        else:
            out = h
        o_ref[...] = out.astype(o_ref.dtype)                 # single cast at the store


def _aggregate(adj, s, bias, *, w_next=None, out_dtype):
    """relu(adj @ s + bias) [@ w_next]; adj:[M,K], s:[K,N], bias:[1,N]."""
    M, K = adj.shape
    K2, N = s.shape
    assert K == K2 and bias.shape == (1, N)

    fuse_next = w_next is not None
    n_out = w_next.shape[1] if fuse_next else N

    tm = _pick_row_tile(M)
    tk = _pick_tile(K, (2048, 1024, 512, 256, 128))
    grid = (M // tm, K // tk)

    vmem_limit = _vmem_limit_bytes()
    s_bytes = s.size * s.dtype.itemsize
    # Keep S fully VMEM-resident (loaded once, never re-DMA'd per row block) whenever
    # its (double-buffered) footprint stays well inside the scoped VMEM budget.
    rhs_resident = (2 * s_bytes) <= (vmem_limit // 2)

    in_specs = [pl.BlockSpec((tm, tk), lambda i, k: (i, k))]      # adj: streamed once
    if rhs_resident:
        in_specs.append(pl.BlockSpec((K, N), lambda i, k: (0, 0)))  # S: resident
    else:
        in_specs.append(pl.BlockSpec((tk, N), lambda i, k: (k, 0)))  # S: streamed
    in_specs.append(pl.BlockSpec((1, N), lambda i, k: (0, 0)))     # bias: resident
    args = [adj, s, bias]
    if fuse_next:
        in_specs.append(pl.BlockSpec((N, n_out), lambda i, k: (0, 0)))  # W2: resident
        args.append(w_next)

    kernel = functools.partial(_agg_kernel, tk=tk, rhs_resident=rhs_resident,
                               fuse_next=fuse_next)

    flops = 2 * M * N * K + (2 * M * N * n_out if fuse_next else 0)
    bytes_accessed = (adj.size * adj.dtype.itemsize + s_bytes
                      + bias.size * bias.dtype.itemsize
                      + (w_next.size * w_next.dtype.itemsize if fuse_next else 0)
                      + M * n_out * jnp.dtype(out_dtype).itemsize)

    return pl.pallas_call(
        kernel,
        out_shape=jax.ShapeDtypeStruct((M, n_out), out_dtype),
        grid_spec=pltpu.PrefetchScalarGridSpec(
            num_scalar_prefetch=0,
            grid=grid,
            in_specs=in_specs,
            out_specs=pl.BlockSpec((tm, n_out), lambda i, k: (i, 0)),
            scratch_shapes=[pltpu.VMEM((tm, N), jnp.float32)],
        ),
        compiler_params=pltpu.CompilerParams(
            dimension_semantics=("parallel", "arbitrary"),
            vmem_limit_bytes=vmem_limit,
        ),
        cost_estimate=pl.CostEstimate(flops=int(flops), transcendentals=0,
                                      bytes_accessed=int(bytes_accessed)),
    )(*args)


# ------------------------------ encoder (jitted) -------------------------------
@functools.partial(jax.jit, static_argnames=("npad", "dpad"))
def _encode_impl(x, adjp, w1p, b1p, w2p, b2p, *, npad, dpad):
    """Padded 2-layer GCN encode; adjp / weights are pre-padded bf16 (cached)."""
    n, d = x.shape
    xp = jnp.zeros((npad, dpad), jnp.bfloat16).at[:n, :d].set(x.astype(jnp.bfloat16))

    # Layer 1 support: s1 = x @ W1 (zero Hyperboloid column already folded into W1).
    s1 = _support_matmul(xp, w1p, out_dtype=jnp.bfloat16)
    # Layer 1 aggregation fused with layer-2 support: s2 = relu(adj @ s1 + b1) @ W2.
    s2 = _aggregate(adjp, s1, b1p, w_next=w2p, out_dtype=jnp.bfloat16)
    # Layer 2 aggregation: h2 = relu(adj @ s2 + b2).
    h2 = _aggregate(adjp, s2, b2p, out_dtype=jnp.float32)
    return h2


# ------------------------------ Model wrapper -----------------------------------
class BaseModelPallas:
    """Mirrors BaseModel.forward for manifold='Hyperboloid' with a 2-layer GCN encoder."""

    def __init__(self, feat_dim, hidden_dim, n_nodes, c=1.0, seed=0):
        self.manifold_name = "Hyperboloid"
        self.c = jnp.array([c], dtype=jnp.float32)   # fixed curvature (args.c is not None)
        self.nnodes = n_nodes
        self.feat_dim = feat_dim
        self.hidden_dim = hidden_dim
        in_dim = feat_dim + 1                        # Hyperboloid: feat_dim = feat_dim + 1

        key = jax.random.PRNGKey(seed)
        k1, k2 = jax.random.split(key)
        # Deterministic Glorot-style init (synthetic weights, no checkpoint load).
        self.w1 = (jax.random.normal(k1, (in_dim, hidden_dim), jnp.float32)
                   * (2.0 / (in_dim + hidden_dim)) ** 0.5)
        self.b1 = jnp.zeros((1, hidden_dim), jnp.float32)
        self.w2 = (jax.random.normal(k2, (hidden_dim, hidden_dim), jnp.float32)
                   * (2.0 / (hidden_dim + hidden_dim)) ** 0.5)
        self.b2 = jnp.zeros((1, hidden_dim), jnp.float32)

        # ---- static padded/bf16 operands, built ONCE (never re-padded per forward) ----
        # The Hyperboloid zero column only multiplies w1[0, :] -> fold it away: pad w1[1:].
        bf16 = jnp.bfloat16
        d = feat_dim
        self._dpad = _round_up(d, 128)
        self._h1p = _round_up(hidden_dim, 128)
        self._h2p = _round_up(hidden_dim, 128)
        self._w1p = (jnp.zeros((self._dpad, self._h1p), bf16)
                     .at[:d, :hidden_dim].set(self.w1[1:].astype(bf16)))
        self._w2p = (jnp.zeros((self._h1p, self._h2p), bf16)
                     .at[:hidden_dim, :hidden_dim].set(self.w2.astype(bf16)))
        self._b1p = (jnp.zeros((1, self._h1p), jnp.float32)
                     .at[:, :hidden_dim].set(self.b1.astype(jnp.float32)))
        self._b2p = (jnp.zeros((1, self._h2p), jnp.float32)
                     .at[:, :hidden_dim].set(self.b2.astype(jnp.float32)))

        # Cached padded bf16 adjacency (adj is static across forward calls).
        self._adj_src = None
        self._adjp = None
        self._npad = None

    def _get_padded_adj(self, adj):
        if self._adjp is not None and self._adj_src is adj:
            return self._adjp, self._npad
        n = adj.shape[0]
        # Pad to 256 multiples for large graphs (keeps 256/512 tiles selectable); zero
        # padding is exact: padded adj rows/cols contribute nothing to real outputs, and
        # the final [:n, :hidden] slice drops the (possibly nonzero-relu-bias) padded rows.
        npad = 128 if n <= 128 else _round_up(n, 256)
        adjp = (jnp.zeros((npad, npad), jnp.bfloat16)
                .at[:n, :n].set(jnp.asarray(adj).astype(jnp.bfloat16)))
        self._adj_src = adj
        self._adjp = jax.block_until_ready(adjp)
        self._npad = npad
        return self._adjp, self._npad

    def forward(self, x, adj):
        adjp, npad = self._get_padded_adj(adj)
        h2 = _encode_impl(x, adjp, self._w1p, self._b1p, self._w2p, self._b2p,
                          npad=npad, dpad=self._dpad)
        n = x.shape[0]
        return h2[:n, :self.hidden_dim]

    __call__ = forward

    # TODO(synk): compute_metrics / init_metric_dict / has_improved are abstract
    # (NotImplementedError in the PyTorch module) and are not kernel work.


# Pure-JAX f32 reference (original concat formulation) for a sanity check.
def _reference(x, adj, model):
    o = jnp.zeros_like(x)
    xc = jnp.concatenate([o[:, 0:1], x], axis=1)
    h1 = jnp.maximum(adj @ (xc @ model.w1) + model.b1, 0.0)
    h2 = jnp.maximum(adj @ (h1 @ model.w2) + model.b2, 0.0)
    return h2


if __name__ == "__main__":
    n_nodes, feat_dim, hidden = 16, 7, 32

    key = jax.random.PRNGKey(0)
    kx, ka = jax.random.split(key)
    x = jax.random.normal(kx, (n_nodes, feat_dim), jnp.float32)

    # Deterministic dense row-normalized adjacency (self-loops included).
    a = (jax.random.uniform(ka, (n_nodes, n_nodes)) > 0.7).astype(jnp.float32)
    a = jnp.maximum(a, a.T) + jnp.eye(n_nodes, dtype=jnp.float32)
    adj = a / jnp.sum(a, axis=1, keepdims=True)

    model = BaseModelPallas(feat_dim=feat_dim, hidden_dim=hidden, n_nodes=n_nodes)

    h = jax.block_until_ready(model(x, adj))
    # Second call exercises the cached padded-adjacency path.
    h2 = jax.block_until_ready(model(x, adj))

    ref = _reference(x, adj, model)
    assert h.shape == (n_nodes, hidden), h.shape
    # bf16 operands with f32 accumulation -> loosened tolerance vs. the f32 reference.
    assert jnp.allclose(h, ref, atol=5e-2, rtol=5e-2), float(jnp.max(jnp.abs(h - ref)))
    assert jnp.allclose(h, h2), "cached-adjacency path diverged"

    print("KERNEL_OK")
</pallas_src>

<mosaic_0001>
module attributes {stable_mosaic.version = 11 : i64} {
  func.func @_matmul_kernel(%arg0: i32, %arg1: i32, %arg2: i32, %arg3: memref<128x128xbf16, #tpu.memory_space<vmem>>, %arg4: memref<128x128xbf16, #tpu.memory_space<vmem>>, %arg5: memref<128x128xbf16, #tpu.memory_space<vmem>>, %arg6: memref<128x128xf32, #tpu.memory_space<vmem>>) attributes {dimension_semantics = [#tpu.dimension_semantics<parallel>, #tpu.dimension_semantics<parallel>, #tpu.dimension_semantics<arbitrary>], iteration_bounds = array<i64: 1, 1, 1>, scalar_prefetch = 0 : i64, scratch_operands = 1 : i64, tpu.core_type = #tpu.core_type<tc>, window_params = [{transform_indices = @transform_0, window_bounds = array<i64: 128, 128>}, {transform_indices = @transform_1, window_bounds = array<i64: 128, 128>}, {transform_indices = @transform_2, window_bounds = array<i64: 128, 128>}]} {
    %c0_i32 = arith.constant 0 : i32
    %0 = arith.cmpi eq, %arg2, %c0_i32 : i32
    %1 = arith.extui %0 : i1 to i32
    %c0_i32_0 = arith.constant 0 : i32
    %2 = arith.cmpi ne, %1, %c0_i32_0 : i32
    scf.if %2 {
      %cst_10 = arith.constant 0.000000e+00 : f32
      %12 = vector.broadcast %cst_10 : f32 to vector<128x128xf32>
      %c0_11 = arith.constant 0 : index
      %c0_12 = arith.constant 0 : index
      %13 = vector.load %arg6[%c0_11, %c0_12] : memref<128x128xf32, #tpu.memory_space<vmem>>, vector<128x128xf32>
      tpu.vector_store %arg6[%c0_11, %c0_12], %12 {strides = array<i32>} : memref<128x128xf32, #tpu.memory_space<vmem>>, vector<128x128xf32>,
    } else {
    }
    %c0 = arith.constant 0 : index
    %c0_1 = arith.constant 0 : index
    %3 = vector.load %arg6[%c0, %c0_1] : memref<128x128xf32, #tpu.memory_space<vmem>>, vector<128x128xf32>
    %c0_2 = arith.constant 0 : index
    %c0_3 = arith.constant 0 : index
    %4 = vector.load %arg3[%c0_2, %c0_3] : memref<128x128xbf16, #tpu.memory_space<vmem>>, vector<128x128xbf16>
    %c0_4 = arith.constant 0 : index
    %c0_5 = arith.constant 0 : index
    %5 = vector.load %arg4[%c0_4, %c0_5] : memref<128x128xbf16, #tpu.memory_space<vmem>>, vector<128x128xbf16>
    %cst = arith.constant dense<0.000000e+00> : vector<128x128xf32>
    %6 = tpu.matmul %4, %5, %cst {dimension_numbers = #tpu.dot_dimension_numbers<[1], [0], [0], [1], [0, 0, 1, 1], [], []>} : vector<128x128xbf16>, vector<128x128xbf16>, vector<128x128xf32> -> vector<128x128xf32>
    %7 = arith.addf %3, %6 : vector<128x128xf32>
    %c0_6 = arith.constant 0 : index
    %c0_7 = arith.constant 0 : index
    %8 = vector.load %arg6[%c0_6, %c0_7] : memref<128x128xf32, #tpu.memory_space<vmem>>, vector<128x128xf32>
    tpu.vector_store %arg6[%c0_6, %c0_7], %7 {strides = array<i32>} : memref<128x128xf32, #tpu.memory_space<vmem>>, vector<128x128xf32>,
    %c0_i32_8 = arith.constant 0 : i32
    %9 = arith.cmpi eq, %arg2, %c0_i32_8 : i32
    %10 = arith.extui %9 : i1 to i32
    %c0_i32_9 = arith.constant 0 : i32
    %11 = arith.cmpi ne, %10, %c0_i32_9 : i32
    scf.if %11 {
      %c0_10 = arith.constant 0 : index
      %c0_11 = arith.constant 0 : index
      %12 = vector.load %arg6[%c0_10, %c0_11] : memref<128x128xf32, #tpu.memory_space<vmem>>, vector<128x128xf32>
      %13 = arith.truncf %12 : vector<128x128xf32> to vector<128x128xbf16>
      %c0_12 = arith.constant 0 : index
      %c0_13 = arith.constant 0 : index
      %14 = vector.load %arg5[%c0_12, %c0_13] : memref<128x128xbf16, #tpu.memory_space<vmem>>, vector<128x128xbf16>
      tpu.vector_store %arg5[%c0_12, %c0_13], %13 {strides = array<i32>} : memref<128x128xbf16, #tpu.memory_space<vmem>>, vector<128x128xbf16>,
    } else {
    }
    return
  }
  func.func @transform_0(%arg0: i32, %arg1: i32, %arg2: i32) -> (i32, i32) {
    %c0_i32 = arith.constant 0 : i32
    return %arg0, %arg2 : i32, i32
  }
  func.func @transform_1(%arg0: i32, %arg1: i32, %arg2: i32) -> (i32, i32) {
    %c0_i32 = arith.constant 0 : i32
    return %arg2, %arg1 : i32, i32
  }
  func.func @transform_2(%arg0: i32, %arg1: i32, %arg2: i32) -> (i32, i32) {
    %c0_i32 = arith.constant 0 : i32
    return %arg0, %arg1 : i32, i32
  }
}

module attributes {stable_mosaic.version = 11 : i64} {
  func.func @_agg_kernel(%arg0: i32, %arg1: i32, %arg2: memref<128x128xbf16, #tpu.memory_space<vmem>>, %arg3: memref<128x128xbf16, #tpu.memory_space<vmem>>, %arg4: memref<1x128xf32, #tpu.memory_space<vmem>>, %arg5: memref<128x128xf32, #tpu.memory_space<vmem>>, %arg6: memref<128x128xf32, #tpu.memory_space<vmem>>) attributes {dimension_semantics = [#tpu.dimension_semantics<parallel>, #tpu.dimension_semantics<arbitrary>], iteration_bounds = array<i64: 1, 1>, scalar_prefetch = 0 : i64, scratch_operands = 1 : i64, tpu.core_type = #tpu.core_type<tc>, window_params = [{transform_indices = @transform_0, window_bounds = array<i64: 128, 128>}, {pipeline_mode = #tpu.pipeline_mode<synchronous>, transform_indices = @transform_1, window_bounds = array<i64: 128, 128>}, {pipeline_mode = #tpu.pipeline_mode<synchronous>, transform_indices = @transform_2, window_bounds = array<i64: 1, 128>}, {transform_indices = @transform_3, window_bounds = array<i64: 128, 128>}]} {
    %c0_i32 = arith.constant 0 : i32
    %0 = arith.cmpi eq, %arg1, %c0_i32 : i32
    %1 = arith.extui %0 : i1 to i32
    %c0_i32_0 = arith.constant 0 : i32
    %2 = arith.cmpi ne, %1, %c0_i32_0 : i32
    scf.if %2 {
      %cst_9 = arith.constant 0.000000e+00 : f32
      %15 = vector.broadcast %cst_9 : f32 to vector<128x128xf32>
      %c0_10 = arith.constant 0 : index
      %c0_11 = arith.constant 0 : index
      %16 = vector.load %arg6[%c0_10, %c0_11] : memref<128x128xf32, #tpu.memory_space<vmem>>, vector<128x128xf32>
      tpu.vector_store %arg6[%c0_10, %c0_11], %15 {strides = array<i32>} : memref<128x128xf32, #tpu.memory_space<vmem>>, vector<128x128xf32>,
    } else {
    }
    %c128_i32 = arith.constant 128 : i32
    %3 = arith.muli %arg1, %c128_i32 : i32
    %4 = tpu.assume_multiple %3, 128 : i32
    %5 = arith.index_cast %4 : i32 to index
    %c0 = arith.constant 0 : index
    %6 = vector.load %arg3[%5, %c0] : memref<128x128xbf16, #tpu.memory_space<vmem>>, vector<128x128xbf16>
    %c0_1 = arith.constant 0 : index
    %c0_2 = arith.constant 0 : index
    %7 = vector.load %arg6[%c0_1, %c0_2] : memref<128x128xf32, #tpu.memory_space<vmem>>, vector<128x128xf32>
    %c0_3 = arith.constant 0 : index
    %c0_4 = arith.constant 0 : index
    %8 = vector.load %arg2[%c0_3, %c0_4] : memref<128x128xbf16, #tpu.memory_space<vmem>>, vector<128x128xbf16>
    %cst = arith.constant dense<0.000000e+00> : vector<128x128xf32>
    %9 = tpu.matmul %8, %6, %cst {dimension_numbers = #tpu.dot_dimension_numbers<[1], [0], [0], [1], [0, 0, 1, 1], [], []>} : vector<128x128xbf16>, vector<128x128xbf16>, vector<128x128xf32> -> vector<128x128xf32>
    %10 = arith.addf %7, %9 : vector<128x128xf32>
    %c0_5 = arith.constant 0 : index
    %c0_6 = arith.constant 0 : index
    %11 = vector.load %arg6[%c0_5, %c0_6] : memref<128x128xf32, #tpu.memory_space<vmem>>, vector<128x128xf32>
    tpu.vector_store %arg6[%c0_5, %c0_6], %10 {strides = array<i32>} : memref<128x128xf32, #tpu.memory_space<vmem>>, vector<128x128xf32>,
    %c0_i32_7 = arith.constant 0 : i32
    %12 = arith.cmpi eq, %arg1, %c0_i32_7 : i32
    %13 = arith.extui %12 : i1 to i32
    %c0_i32_8 = arith.constant 0 : i32
    %14 = arith.cmpi ne, %13, %c0_i32_8 : i32
    scf.if %14 {
      %c0_9 = arith.constant 0 : index
      %c0_10 = arith.constant 0 : index
      %15 = vector.load %arg6[%c0_9, %c0_10] : memref<128x128xf32, #tpu.memory_space<vmem>>, vector<128x128xf32>
      %c0_11 = arith.constant 0 : index
      %c0_12 = arith.constant 0 : index
      %16 = vector.load %arg4[%c0_11, %c0_12] : memref<1x128xf32, #tpu.memory_space<vmem>>, vector<1x128xf32>
      %17 = vector.broadcast %16 : vector<1x128xf32> to vector<128x128xf32>
      %18 = arith.addf %15, %17 : vector<128x128xf32>
      %cst_13 = arith.constant 0.000000e+00 : f32
      %19 = vector.broadcast %cst_13 : f32 to vector<128x128xf32>
      %20 = arith.maximumf %18, %19 : vector<128x128xf32>
      %c0_14 = arith.constant 0 : index
      %c0_15 = arith.constant 0 : index
      %21 = vector.load %arg5[%c0_14, %c0_15] : memref<128x128xf32, #tpu.memory_space<vmem>>, vector<128x128xf32>
      tpu.vector_store %arg5[%c0_14, %c0_15], %20 {strides = array<i32>} : memref<128x128xf32, #tpu.memory_space<vmem>>, vector<128x128xf32>,
    } else {
    }
    return
  }
  func.func @transform_0(%arg0: i32, %arg1: i32) -> (i32, i32) {
    %c0_i32 = arith.constant 0 : i32
    return %arg0, %arg1 : i32, i32
  }
  func.func @transform_1(%arg0: i32, %arg1: i32) -> (i32, i32) {
    %c0_i32 = arith.constant 0 : i32
    %c0_i32_0 = arith.constant 0 : i32
    %c0_i32_1 = arith.constant 0 : i32
    return %c0_i32, %c0_i32_0 : i32, i32
  }
  func.func @transform_2(%arg0: i32, %arg1: i32) -> (i32, i32) {
    %c0_i32 = arith.constant 0 : i32
    %c0_i32_0 = arith.constant 0 : i32
    %c0_i32_1 = arith.constant 0 : i32
    return %c0_i32, %c0_i32_0 : i32, i32
  }
  func.func @transform_3(%arg0: i32, %arg1: i32) -> (i32, i32) {
    %c0_i32 = arith.constant 0 : i32
    %c0_i32_0 = arith.constant 0 : i32
    return %arg0, %c0_i32 : i32, i32
  }
}

module attributes {stable_mosaic.version = 11 : i64} {
  func.func @_agg_kernel(%arg0: i32, %arg1: i32, %arg2: memref<128x128xbf16, #tpu.memory_space<vmem>>, %arg3: memref<128x128xbf16, #tpu.memory_space<vmem>>, %arg4: memref<1x128xf32, #tpu.memory_space<vmem>>, %arg5: memref<128x128xbf16, #tpu.memory_space<vmem>>, %arg6: memref<128x128xbf16, #tpu.memory_space<vmem>>, %arg7: memref<128x128xf32, #tpu.memory_space<vmem>>) attributes {dimension_semantics = [#tpu.dimension_semantics<parallel>, #tpu.dimension_semantics<arbitrary>], iteration_bounds = array<i64: 1, 1>, scalar_prefetch = 0 : i64, scratch_operands = 1 : i64, tpu.core_type = #tpu.core_type<tc>, window_params = [{transform_indices = @transform_0, window_bounds = array<i64: 128, 128>}, {pipeline_mode = #tpu.pipeline_mode<synchronous>, transform_indices = @transform_1, window_bounds = array<i64: 128, 128>}, {pipeline_mode = #tpu.pipeline_mode<synchronous>, transform_indices = @transform_2, window_bounds = array<i64: 1, 128>}, {pipeline_mode = #tpu.pipeline_mode<synchronous>, transform_indices = @transform_3, window_bounds = array<i64: 128, 128>}, {transform_indices = @transform_4, window_bounds = array<i64: 128, 128>}]} {
    %c0_i32 = arith.constant 0 : i32
    %0 = arith.cmpi eq, %arg1, %c0_i32 : i32
    %1 = arith.extui %0 : i1 to i32
    %c0_i32_0 = arith.constant 0 : i32
    %2 = arith.cmpi ne, %1, %c0_i32_0 : i32
    scf.if %2 {
      %cst_9 = arith.constant 0.000000e+00 : f32
      %15 = vector.broadcast %cst_9 : f32 to vector<128x128xf32>
      %c0_10 = arith.constant 0 : index
      %c0_11 = arith.constant 0 : index
      %16 = vector.load %arg7[%c0_10, %c0_11] : memref<128x128xf32, #tpu.memory_space<vmem>>, vector<128x128xf32>
      tpu.vector_store %arg7[%c0_10, %c0_11], %15 {strides = array<i32>} : memref<128x128xf32, #tpu.memory_space<vmem>>, vector<128x128xf32>,
    } else {
    }
    %c128_i32 = arith.constant 128 : i32
    %3 = arith.muli %arg1, %c128_i32 : i32
    %4 = tpu.assume_multiple %3, 128 : i32
    %5 = arith.index_cast %4 : i32 to index
    %c0 = arith.constant 0 : index
    %6 = vector.load %arg3[%5, %c0] : memref<128x128xbf16, #tpu.memory_space<vmem>>, vector<128x128xbf16>
    %c0_1 = arith.constant 0 : index
    %c0_2 = arith.constant 0 : index
    %7 = vector.load %arg7[%c0_1, %c0_2] : memref<128x128xf32, #tpu.memory_space<vmem>>, vector<128x128xf32>
    %c0_3 = arith.constant 0 : index
    %c0_4 = arith.constant 0 : index
    %8 = vector.load %arg2[%c0_3, %c0_4] : memref<128x128xbf16, #tpu.memory_space<vmem>>, vector<128x128xbf16>
    %cst = arith.constant dense<0.000000e+00> : vector<128x128xf32>
    %9 = tpu.matmul %8, %6, %cst {dimension_numbers = #tpu.dot_dimension_numbers<[1], [0], [0], [1], [0, 0, 1, 1], [], []>} : vector<128x128xbf16>, vector<128x128xbf16>, vector<128x128xf32> -> vector<128x128xf32>
    %10 = arith.addf %7, %9 : vector<128x128xf32>
    %c0_5 = arith.constant 0 : index
    %c0_6 = arith.constant 0 : index
    %11 = vector.load %arg7[%c0_5, %c0_6] : memref<128x128xf32, #tpu.memory_space<vmem>>, vector<128x128xf32>
    tpu.vector_store %arg7[%c0_5, %c0_6], %10 {strides = array<i32>} : memref<128x128xf32, #tpu.memory_space<vmem>>, vector<128x128xf32>,
    %c0_i32_7 = arith.constant 0 : i32
    %12 = arith.cmpi eq, %arg1, %c0_i32_7 : i32
    %13 = arith.extui %12 : i1 to i32
    %c0_i32_8 = arith.constant 0 : i32
    %14 = arith.cmpi ne, %13, %c0_i32_8 : i32
    scf.if %14 {
      %c0_9 = arith.constant 0 : index
      %c0_10 = arith.constant 0 : index
      %15 = vector.load %arg7[%c0_9, %c0_10] : memref<128x128xf32, #tpu.memory_space<vmem>>, vector<128x128xf32>
      %c0_11 = arith.constant 0 : index
      %c0_12 = arith.constant 0 : index
      %16 = vector.load %arg4[%c0_11, %c0_12] : memref<1x128xf32, #tpu.memory_space<vmem>>, vector<1x128xf32>
      %17 = vector.broadcast %16 : vector<1x128xf32> to vector<128x128xf32>
      %18 = arith.addf %15, %17 : vector<128x128xf32>
      %cst_13 = arith.constant 0.000000e+00 : f32
      %19 = vector.broadcast %cst_13 : f32 to vector<128x128xf32>
      %20 = arith.maximumf %18, %19 : vector<128x128xf32>
      %21 = arith.truncf %20 : vector<128x128xf32> to vector<128x128xbf16>
      %c0_14 = arith.constant 0 : index
      %c0_15 = arith.constant 0 : index
      %22 = vector.load %arg5[%c0_14, %c0_15] : memref<128x128xbf16, #tpu.memory_space<vmem>>, vector<128x128xbf16>
      %cst_16 = arith.constant dense<0.000000e+00> : vector<128x128xf32>
      %23 = tpu.matmul %21, %22, %cst_16 {dimension_numbers = #tpu.dot_dimension_numbers<[1], [0], [0], [1], [0, 0, 1, 1], [], []>} : vector<128x128xbf16>, vector<128x128xbf16>, vector<128x128xf32> -> vector<128x128xf32>
      %24 = arith.truncf %23 : vector<128x128xf32> to vector<128x128xbf16>
      %c0_17 = arith.constant 0 : index
      %c0_18 = arith.constant 0 : index
      %25 = vector.load %arg6[%c0_17, %c0_18] : memref<128x128xbf16, #tpu.memory_space<vmem>>, vector<128x128xbf16>
      tpu.vector_store %arg6[%c0_17, %c0_18], %24 {strides = array<i32>} : memref<128x128xbf16, #tpu.memory_space<vmem>>, vector<128x128xbf16>,
    } else {
    }
    return
  }
  func.func @transform_0(%arg0: i32, %arg1: i32) -> (i32, i32) {
    %c0_i32 = arith.constant 0 : i32
    return %arg0, %arg1 : i32, i32
  }
  func.func @transform_1(%arg0: i32, %arg1: i32) -> (i32, i32) {
    %c0_i32 = arith.constant 0 : i32
    %c0_i32_0 = arith.constant 0 : i32
    %c0_i32_1 = arith.constant 0 : i32
    return %c0_i32, %c0_i32_0 : i32, i32
  }
  func.func @transform_2(%arg0: i32, %arg1: i32) -> (i32, i32) {
    %c0_i32 = arith.constant 0 : i32
    %c0_i32_0 = arith.constant 0 : i32
    %c0_i32_1 = arith.constant 0 : i32
    return %c0_i32, %c0_i32_0 : i32, i32
  }
  func.func @transform_3(%arg0: i32, %arg1: i32) -> (i32, i32) {
    %c0_i32 = arith.constant 0 : i32
    %c0_i32_0 = arith.constant 0 : i32
    %c0_i32_1 = arith.constant 0 : i32
    return %c0_i32, %c0_i32_0 : i32, i32
  }
  func.func @transform_4(%arg0: i32, %arg1: i32) -> (i32, i32) {
    %c0_i32 = arith.constant 0 : i32
    %c0_i32_0 = arith.constant 0 : i32
    return %arg0, %c0_i32 : i32, i32
  }
}

</mosaic_0001>

<bundles_post_ra>
// kernel: _encode_impl.4
= control target key start
LH: loop header
LB: loop body
LE: loop exit
PB: predicated region body
PF: predicated region fallthrough
CT: control target
= control target key end

     0   :  { %s977_s1 = inlined_call_operand.vmem [shape: bf16[128,128], index: 1, kind: input, shape index: {}]   ;;  %s978_s0 = inlined_call_operand.vmem [shape: bf16[128,128], index: 0, kind: input, shape index: {}]   ;;  %s979_s3 = inlined_call_operand.vmem [shape: bf16[128,128], index: 3, kind: input, shape index: {}]   ;;  %s980_s2 = inlined_call_operand.vmem [shape: f32[1,128], index: 2, kind: input, shape index: {}]   ;;  %s981_s4 = inlined_call_operand.vmem [shape: bf16[128,128], index: 4, kind: output, shape index: {}]  }
   0x1   :  { %v829_v0 = vld [vmem:[%s977_s1] sm:$0xff]   ;;  %v830_v1 = vld [vmem:[%s977_s1 + $0x8] sm:$0xff]   ;;  %v831_v2 = vld [vmem:[%s977_s1 + $0x10] sm:$0xff]  }
   0x2   :  { %765 = vmatprep.subr.bf16.mxu0 %v829_v0  ;;  %v832_v3 = vld [vmem:[%s977_s1 + $0x18] sm:$0xff]   ;;  %v837_v4 = vld [vmem:[%s978_s0] sm:$0xff]   ;;  %v834_v6 = vld [vmem:[%s977_s1 + $0x28] sm:$0xff]  }
   0x3   :  { %766 = vmatpush3.bf16.msra.mxu0 %v829_v0  ;;  %781 = vmatprep.mubr.bf16.mxu0 %v837_v4  ;;  %v833_v5 = vld [vmem:[%s977_s1 + $0x20] sm:$0xff]   ;;  %v846_v8 = vld [vmem:[%s979_s3 + $0x8] sm:$0xff]   ;;  %v835_v9 = vld [vmem:[%s977_s1 + $0x30] sm:$0xff]  }
   0x4   :  { %767 = vmatprep.subr.bf16.mxu0 %v830_v1  ;;  %v845_v7 = vld [vmem:[%s979_s3] sm:$0xff]   ;;  %v847_v10 = vld [vmem:[%s979_s3 + $0x10] sm:$0xff]   ;;  %v836_v11 = vld [vmem:[%s977_s1 + $0x38] sm:$0xff]  }
   0x5   :  { %797 = vmatprep.subr.bf16.mxu1 %v845_v7  ;;  %v848_v12 = vld [vmem:[%s979_s3 + $0x18] sm:$0xff]   ;;  %v849_v13 = vld [vmem:[%s979_s3 + $0x20] sm:$0xff]   ;;  %v838_v14 = vld [vmem:[%s978_s0 + $0x8] sm:$0xff]  }
   0x6   :  { %798 = vmatpush3.bf16.msra.mxu1 %v845_v7  ;;  %v839_v15 = vld [vmem:[%s978_s0 + $0x10] sm:$0xff]   ;;  %v850_v16 = vld [vmem:[%s979_s3 + $0x28] sm:$0xff]   ;;  %v840_v17 = vld [vmem:[%s978_s0 + $0x18] sm:$0xff]  }
   0x7   :  { %768 = vmatpush3.bf16.msra.mxu0 %v830_v1  ;;  %799 = vmatprep.subr.bf16.mxu1 %v846_v8  ;;  %v841_v18 = vld [vmem:[%s978_s0 + $0x20] sm:$0xff]   ;;  %v842_v19 = vld [vmem:[%s978_s0 + $0x28] sm:$0xff]   ;;  %v843_v20 = vld [vmem:[%s978_s0 + $0x30] sm:$0xff]  }
   0x8   :  { %769 = vmatprep.subr.bf16.mxu0 %v831_v2  ;;  %v844_v21 = vld [vmem:[%s978_s0 + $0x38] sm:$0xff]   ;;  %v851_v22 = vld [vmem:[%s979_s3 + $0x30] sm:$0xff]   ;;  %v645_v24 = vld [vmem:[%s980_s2] ss:$0 sm:$0xff] }
   0x9   :  { %v852_v23 = vld [vmem:[%s979_s3 + $0x38] sm:$0xff]  }
   0xa   :  { %800 = vmatpush3.bf16.msra.mxu1 %v846_v8 }
   0xb   :  { %770 = vmatpush3.bf16.msra.mxu0 %v831_v2  ;;  %801 = vmatprep.subr.bf16.mxu1 %v847_v10 }
   0xc   :  { %771 = vmatprep.subr.bf16.mxu0 %v832_v3 }
   0xe   :  { %802 = vmatpush3.bf16.msra.mxu1 %v847_v10 }
   0xf   :  { %772 = vmatpush3.bf16.msra.mxu0 %v832_v3  ;;  %803 = vmatprep.subr.bf16.mxu1 %v848_v12 }
  0x10   :  { %773 = vmatprep.subr.bf16.mxu0 %v833_v5 }
  0x12   :  { %804 = vmatpush3.bf16.msra.mxu1 %v848_v12 }
  0x13   :  { %774 = vmatpush3.bf16.msra.mxu0 %v833_v5  ;;  %805 = vmatprep.subr.bf16.mxu1 %v849_v13 }
  0x14   :  { %775 = vmatprep.subr.bf16.mxu0 %v834_v6 }
  0x16   :  { %806 = vmatpush3.bf16.msra.mxu1 %v849_v13 }
  0x17   :  { %776 = vmatpush3.bf16.msra.mxu0 %v834_v6  ;;  %807 = vmatprep.subr.bf16.mxu1 %v850_v16 }
  0x18   :  { %777 = vmatprep.subr.bf16.mxu0 %v835_v9 }
  0x1a   :  { %808 = vmatpush3.bf16.msra.mxu1 %v850_v16 }
  0x1b   :  { %778 = vmatpush3.bf16.msra.mxu0 %v835_v9  ;;  %809 = vmatprep.subr.bf16.mxu1 %v851_v22 }
  0x1c   :  { %779 = vmatprep.subr.bf16.mxu0 %v836_v11 }
  0x1e   :  { %810 = vmatpush3.bf16.msra.mxu1 %v851_v22 }
  0x1f   :  { %780 = vmatpush3.bf16.msra.mxu0 %v836_v11  ;;  %811 = vmatprep.subr.bf16.mxu1 %v852_v23 }
  0x22   :  { %782 = vmatmul.mubr.bf16.vlgmr.msra.gmra.mrb[0].mxu0 %v838_v14  ;;  %812 = vmatpush3.bf16.msra.mxu1 %v852_v23 }
  0x23   :  { %785 = vmatprep.mubr.bf16.mxu0 %v839_v15 }
  0x2a   :  { %786 = vmatmul.mubr.bf16.gmra.mrb[4].mxu0 %v840_v17 }
  0x2b   :  { %789 = vmatprep.mubr.bf16.mxu0 %v841_v18 }
  0x32   :  { %790 = vmatmul.mubr.bf16.gmra.mrb[8].mxu0 %v842_v19 }
  0x33   :  { %793 = vmatprep.mubr.bf16.mxu0 %v843_v20 }
  0x3a   :  { %794 = vmatmul.mubr.bf16.gmra.mrb[12].mxu0 %v844_v21 }
  0xf5   :  { %v783_v25 = vpop.f32.mrb[0].mxu0 }
  0xf6   :  { %v344_v26 = vadd.f32 %v783_v25, %v645_v24  ;;  %v221_v27 = vpop.f32.mrb[1].mxu0 }
  0xf7   :  { %v342_v28 = vadd.f32 %v645_v24, %v221_v27  ;;  %v784_v29 = vpop.f32.mrb[2].mxu0 }
  0xf8   :  { %v345_v30 = vadd.f32 %v784_v29, %v645_v24  ;;  %v224_v31 = vpop.f32.mrb[3].mxu0  ;;  %v360_v33 = vmax.f32 %v344_v26, 0.0 }
  0xf9   :  { %v343_v32 = vadd.f32 %v645_v24, %v224_v31  ;;  %v358_v35 = vmax.f32 %v342_v28, 0.0 }
  0xfa   :  { %v361_v34 = vmax.f32 %v345_v30, 0.0 }
  0xfb   :  { %v359_v36 = vmax.f32 %v343_v32, 0.0 }
  0xfc   :  { %v375_v37 = vpack.c.bf16 %v361_v34, %v360_v33 }
  0xfd   :  { %v787_v38 = vpop.f32.mrb[4].mxu0  ;;  %v374_v39 = vpack.c.bf16 %v359_v36, %v358_v35 }
  0xfe   :  { %v348_v40 = vadd.f32 %v787_v38, %v645_v24  ;;  %v237_v41 = vpop.f32.mrb[5].mxu0 }
  0xff   :  { %v346_v42 = vadd.f32 %v645_v24, %v237_v41  ;;  %v788_v43 = vpop.f32.mrb[6].mxu0  ;;  %813 = vmatprep.mubr.bf16.mxu1 %v374_v39 }
 0x100   :  { %v349_v44 = vadd.f32 %v788_v43, %v645_v24  ;;  %v240_v45 = vpop.f32.mrb[7].mxu0  ;;  %814 = vmatmul.mubr.bf16.vlgmr.msra.gmra.mrb[0].mxu1 %v375_v37  ;;  %v364_v47 = vmax.f32 %v348_v40, 0.0 }
 0x101   :  { %v347_v46 = vadd.f32 %v645_v24, %v240_v45  ;;  %v362_v49 = vmax.f32 %v346_v42, 0.0 }
 0x102   :  { %v365_v48 = vmax.f32 %v349_v44, 0.0 }
 0x103   :  { %v363_v50 = vmax.f32 %v347_v46, 0.0 }
 0x104   :  { %v377_v51 = vpack.c.bf16 %v365_v48, %v364_v47 }
 0x105   :  { %v376_v52 = vpack.c.bf16 %v363_v50, %v362_v49  ;;  %v791_v53 = vpop.f32.mrb[8].mxu0 }
 0x106   :  { %v352_v54 = vadd.f32 %v791_v53, %v645_v24  ;;  %v253_v55 = vpop.f32.mrb[9].mxu0 }
 0x107   :  { %v350_v56 = vadd.f32 %v645_v24, %v253_v55  ;;  %v792_v57 = vpop.f32.mrb[10].mxu0  ;;  %817 = vmatprep.mubr.bf16.mxu1 %v376_v52 }
 0x108   :  { %v353_v58 = vadd.f32 %v792_v57, %v645_v24  ;;  %v256_v59 = vpop.f32.mrb[11].mxu0  ;;  %818 = vmatmul.mubr.bf16.gmra.mrb[4].mxu1 %v377_v51  ;;  %v368_v61 = vmax.f32 %v352_v54, 0.0 }
 0x109   :  { %v351_v60 = vadd.f32 %v645_v24, %v256_v59  ;;  %v366_v63 = vmax.f32 %v350_v56, 0.0 }
 0x10a   :  { %v369_v62 = vmax.f32 %v353_v58, 0.0 }
 0x10b   :  { %v367_v0 = vmax.f32 %v351_v60, 0.0 }
 0x10c   :  { %v379_v1 = vpack.c.bf16 %v369_v62, %v368_v61 }
 0x10d   :  { %v378_v2 = vpack.c.bf16 %v367_v0, %v366_v63  ;;  %v795_v3 = vpop.f32.mrb[12].mxu0 }
 0x10e   :  { %v356_v4 = vadd.f32 %v795_v3, %v645_v24  ;;  %v269_v5 = vpop.f32.mrb[13].mxu0 }
 0x10f   :  { %v354_v6 = vadd.f32 %v645_v24, %v269_v5  ;;  %v796_v7 = vpop.f32.mrb[14].mxu0  ;;  %821 = vmatprep.mubr.bf16.mxu1 %v378_v2 }
 0x110   :  { %v357_v8 = vadd.f32 %v796_v7, %v645_v24  ;;  %v272_v9 = vpop.f32.mrb[15].mxu0  ;;  %822 = vmatmul.mubr.bf16.gmra.mrb[8].mxu1 %v379_v1  ;;  %v372_v11 = vmax.f32 %v356_v4, 0.0 }
 0x111   :  { %v355_v10 = vadd.f32 %v645_v24, %v272_v9  ;;  %v370_v13 = vmax.f32 %v354_v6, 0.0 }
 0x112   :  { %v373_v12 = vmax.f32 %v357_v8, 0.0 }
 0x113   :  { %v371_v14 = vmax.f32 %v355_v10, 0.0 }
 0x114   :  { %v381_v15 = vpack.c.bf16 %v373_v12, %v372_v11 }
 0x115   :  { %v380_v16 = vpack.c.bf16 %v371_v14, %v370_v13 }
 0x117   :  { %825 = vmatprep.mubr.bf16.mxu1 %v380_v16 }
 0x118   :  { %826 = vmatmul.mubr.bf16.gmra.mrb[12].mxu1 %v381_v15 }
 0x1d3   :  { %v815_v17 = vpop.f32.mrb[0].mxu1 }
 0x1d4   :  { %v480_v18 = vpop.f32.mrb[1].mxu1 }
 0x1d5   :  { %v816_v19 = vpop.f32.mrb[2].mxu1 }
 0x1d6   :  { %v694_v20 = vpack.c.bf16 %v816_v19, %v815_v17  ;;  %v483_v21 = vpop.f32.mrb[3].mxu1 }
 0x1d7   :  { %v689_v22 = vpack.c.bf16 %v483_v21, %v480_v18 }
 0x1d8   :  { %726 = vst [vmem:[%s981_s4 + $0x8] sm:$0xff] %v694_v20  }
 0x1d9   :  { %690 = vst [vmem:[%s981_s4] sm:$0xff] %v689_v22  }
 0x1db   :  { %v819_v23 = vpop.f32.mrb[4].mxu1 }
 0x1dc   :  { %v496_v24 = vpop.f32.mrb[5].mxu1 }
 0x1dd   :  { %v820_v25 = vpop.f32.mrb[6].mxu1 }
 0x1de   :  { %v704_v26 = vpack.c.bf16 %v820_v25, %v819_v23  ;;  %v499_v27 = vpop.f32.mrb[7].mxu1 }
 0x1df   :  { %v699_v28 = vpack.c.bf16 %v499_v27, %v496_v24 }
 0x1e0   :  { %728 = vst [vmem:[%s981_s4 + $0x18] sm:$0xff] %v704_v26  }
 0x1e1   :  { %727 = vst [vmem:[%s981_s4 + $0x10] sm:$0xff] %v699_v28  }
 0x1e3   :  { %v823_v29 = vpop.f32.mrb[8].mxu1 }
 0x1e4   :  { %v512_v30 = vpop.f32.mrb[9].mxu1 }
 0x1e5   :  { %v824_v31 = vpop.f32.mrb[10].mxu1 }
 0x1e6   :  { %v714_v32 = vpack.c.bf16 %v824_v31, %v823_v29  ;;  %v515_v33 = vpop.f32.mrb[11].mxu1 }
 0x1e7   :  { %v709_v34 = vpack.c.bf16 %v515_v33, %v512_v30 }
 0x1e8   :  { %730 = vst [vmem:[%s981_s4 + $0x28] sm:$0xff] %v714_v32  }
 0x1e9   :  { %729 = vst [vmem:[%s981_s4 + $0x20] sm:$0xff] %v709_v34  }
 0x1eb   :  { %v827_v35 = vpop.f32.mrb[12].mxu1 }
 0x1ec   :  { %v528_v36 = vpop.f32.mrb[13].mxu1 }
 0x1ed   :  { %v828_v37 = vpop.f32.mrb[14].mxu1 }
 0x1ee   :  { %v724_v38 = vpack.c.bf16 %v828_v37, %v827_v35  ;;  %v531_v39 = vpop.f32.mrb[15].mxu1 }
 0x1ef   :  { %v719_v40 = vpack.c.bf16 %v531_v39, %v528_v36 }
 0x1f0   :  { %732 = vst [vmem:[%s981_s4 + $0x38] sm:$0xff] %v724_v38  }
 0x1f1   :  { %731 = vst [vmem:[%s981_s4 + $0x30] sm:$0xff] %v719_v40  }

// kernel: _encode_impl.3
= control target key start
LH: loop header
LB: loop body
LE: loop exit
PB: predicated region body
PF: predicated region fallthrough
CT: control target
= control target key end

     0   :  { %s670_s1 = inlined_call_operand.vmem [shape: bf16[128,128], index: 1, kind: input, shape index: {}]   ;;  %s671_s0 = inlined_call_operand.vmem [shape: bf16[128,128], index: 0, kind: input, shape index: {}]   ;;  %s672_s2 = inlined_call_operand.vmem [shape: bf16[128,128], index: 2, kind: output, shape index: {}]  }
   0x1   :  { %v567_v0 = vld [vmem:[%s670_s1] sm:$0xff]   ;;  %v568_v1 = vld [vmem:[%s670_s1 + $0x8] sm:$0xff]   ;;  %v569_v2 = vld [vmem:[%s670_s1 + $0x10] sm:$0xff]  }
   0x2   :  { %519 = vmatprep.subr.bf16.mxu0 %v567_v0  ;;  %551 = vmatprep.subr.bf16.mxu1 %v567_v0  ;;  %v570_v3 = vld [vmem:[%s670_s1 + $0x18] sm:$0xff]   ;;  %v575_v4 = vld [vmem:[%s671_s0] sm:$0xff]   ;;  %v572_v7 = vld [vmem:[%s670_s1 + $0x28] sm:$0xff]  }
   0x3   :  { %520 = vmatpush3.bf16.msra.mxu0 %v567_v0  ;;  %559 = vmatpush3.bf16.msra.mxu1 %v567_v0  ;;  %v576_v5 = vld [vmem:[%s671_s0 + $0x20] sm:$0xff]   ;;  %v573_v8 = vld [vmem:[%s670_s1 + $0x30] sm:$0xff]   ;;  %v574_v9 = vld [vmem:[%s670_s1 + $0x38] sm:$0xff]  }
   0x4   :  { %521 = vmatprep.subr.bf16.mxu0 %v568_v1  ;;  %552 = vmatprep.subr.bf16.mxu1 %v568_v1  ;;  %v571_v6 = vld [vmem:[%s670_s1 + $0x20] sm:$0xff]   ;;  %v577_v10 = vld [vmem:[%s671_s0 + $0x8] sm:$0xff]   ;;  %v579_v12 = vld [vmem:[%s671_s0 + $0x10] sm:$0xff]  }
   0x5   :  { %535 = vmatprep.mubr.bf16.mxu0 %v575_v4  ;;  %543 = vmatprep.mubr.bf16.mxu1 %v576_v5  ;;  %v578_v11 = vld [vmem:[%s671_s0 + $0x28] sm:$0xff]   ;;  %v580_v13 = vld [vmem:[%s671_s0 + $0x30] sm:$0xff]   ;;  %v581_v14 = vld [vmem:[%s671_s0 + $0x18] sm:$0xff]  }
   0x6   :  { %v582_v15 = vld [vmem:[%s671_s0 + $0x38] sm:$0xff]  }
   0x7   :  { %522 = vmatpush3.bf16.msra.mxu0 %v568_v1  ;;  %560 = vmatpush3.bf16.msra.mxu1 %v568_v1 }
   0x8   :  { %523 = vmatprep.subr.bf16.mxu0 %v569_v2  ;;  %553 = vmatprep.subr.bf16.mxu1 %v569_v2 }
   0xb   :  { %524 = vmatpush3.bf16.msra.mxu0 %v569_v2  ;;  %561 = vmatpush3.bf16.msra.mxu1 %v569_v2 }
   0xc   :  { %525 = vmatprep.subr.bf16.mxu0 %v570_v3  ;;  %554 = vmatprep.subr.bf16.mxu1 %v570_v3 }
   0xf   :  { %526 = vmatpush3.bf16.msra.mxu0 %v570_v3  ;;  %562 = vmatpush3.bf16.msra.mxu1 %v570_v3 }
  0x10   :  { %527 = vmatprep.subr.bf16.mxu0 %v571_v6  ;;  %555 = vmatprep.subr.bf16.mxu1 %v571_v6 }
  0x13   :  { %528 = vmatpush3.bf16.msra.mxu0 %v571_v6  ;;  %563 = vmatpush3.bf16.msra.mxu1 %v571_v6 }
  0x14   :  { %529 = vmatprep.subr.bf16.mxu0 %v572_v7  ;;  %556 = vmatprep.subr.bf16.mxu1 %v572_v7 }
  0x17   :  { %530 = vmatpush3.bf16.msra.mxu0 %v572_v7  ;;  %564 = vmatpush3.bf16.msra.mxu1 %v572_v7 }
  0x18   :  { %531 = vmatprep.subr.bf16.mxu0 %v573_v8  ;;  %557 = vmatprep.subr.bf16.mxu1 %v573_v8 }
  0x1b   :  { %532 = vmatpush3.bf16.msra.mxu0 %v573_v8  ;;  %565 = vmatpush3.bf16.msra.mxu1 %v573_v8 }
  0x1c   :  { %533 = vmatprep.subr.bf16.mxu0 %v574_v9  ;;  %558 = vmatprep.subr.bf16.mxu1 %v574_v9 }
  0x1f   :  { %534 = vmatpush3.bf16.msra.mxu0 %v574_v9  ;;  %566 = vmatpush3.bf16.msra.mxu1 %v574_v9 }
  0x22   :  { %536 = vmatmul.mubr.bf16.vlgmr.msra.gmra.mrb[0].mxu0 %v577_v10  ;;  %544 = vmatmul.mubr.bf16.vlgmr.msra.gmra.mrb[0].mxu1 %v578_v11 }
  0x23   :  { %539 = vmatprep.mubr.bf16.mxu0 %v579_v12  ;;  %547 = vmatprep.mubr.bf16.mxu1 %v580_v13 }
  0x2a   :  { %540 = vmatmul.mubr.bf16.gmra.mrb[4].mxu0 %v581_v14  ;;  %548 = vmatmul.mubr.bf16.gmra.mrb[4].mxu1 %v582_v15 }
  0xf5   :  { %v537_v16 = vpop.f32.mrb[0].mxu0  ;;  %v545_v17 = vpop.f32.mrb[0].mxu1 }
  0xf6   :  { %v210_v18 = vpop.f32.mrb[1].mxu0  ;;  %v242_v19 = vpop.f32.mrb[1].mxu1 }
  0xf7   :  { %v538_v20 = vpop.f32.mrb[2].mxu0  ;;  %v546_v21 = vpop.f32.mrb[2].mxu1 }
  0xf8   :  { %v464_v22 = vpack.c.bf16 %v538_v20, %v537_v16  ;;  %v484_v23 = vpack.c.bf16 %v546_v21, %v545_v17  ;;  %v213_v24 = vpop.f32.mrb[3].mxu0  ;;  %v245_v25 = vpop.f32.mrb[3].mxu1 }
  0xf9   :  { %v459_v26 = vpack.c.bf16 %v213_v24, %v210_v18  ;;  %v479_v27 = vpack.c.bf16 %v245_v25, %v242_v19 }
  0xfa   :  { %496 = vst [vmem:[%s672_s2 + $0x8] sm:$0xff] %v464_v22   ;;  %500 = vst [vmem:[%s672_s2 + $0x28] sm:$0xff] %v484_v23  }
  0xfb   :  { %460 = vst [vmem:[%s672_s2] sm:$0xff] %v459_v26   ;;  %499 = vst [vmem:[%s672_s2 + $0x20] sm:$0xff] %v479_v27  }
  0xfd   :  { %v541_v28 = vpop.f32.mrb[4].mxu0  ;;  %v549_v29 = vpop.f32.mrb[4].mxu1 }
  0xfe   :  { %v226_v30 = vpop.f32.mrb[5].mxu0  ;;  %v258_v31 = vpop.f32.mrb[5].mxu1 }
  0xff   :  { %v542_v32 = vpop.f32.mrb[6].mxu0  ;;  %v550_v33 = vpop.f32.mrb[6].mxu1 }
 0x100   :  { %v474_v34 = vpack.c.bf16 %v542_v32, %v541_v28  ;;  %v494_v35 = vpack.c.bf16 %v550_v33, %v549_v29  ;;  %v229_v36 = vpop.f32.mrb[7].mxu0  ;;  %v261_v37 = vpop.f32.mrb[7].mxu1 }
 0x101   :  { %v469_v38 = vpack.c.bf16 %v229_v36, %v226_v30  ;;  %v489_v39 = vpack.c.bf16 %v261_v37, %v258_v31 }
 0x102   :  { %498 = vst [vmem:[%s672_s2 + $0x18] sm:$0xff] %v474_v34   ;;  %502 = vst [vmem:[%s672_s2 + $0x38] sm:$0xff] %v494_v35  }
 0x103   :  { %497 = vst [vmem:[%s672_s2 + $0x10] sm:$0xff] %v469_v38   ;;  %501 = vst [vmem:[%s672_s2 + $0x30] sm:$0xff] %v489_v39  }

// kernel: _encode_impl.5
= control target key start
LH: loop header
LB: loop body
LE: loop exit
PB: predicated region body
PF: predicated region fallthrough
CT: control target
= control target key end

     0   :  { %s616_s0 = inlined_call_operand.vmem [shape: bf16[128,128], index: 0, kind: input, shape index: {}]   ;;  %s617_s1 = inlined_call_operand.vmem [shape: bf16[128,128], index: 1, kind: input, shape index: {}]   ;;  %s618_s2 = inlined_call_operand.vmem [shape: f32[1,128], index: 2, kind: input, shape index: {}]   ;;  %s619_s3 = inlined_call_operand.hbm [shape: f32[128,128], index: 3, kind: output, shape index: {}]  }
   0x1   :  { %v490_v0 = vld [vmem:[%s617_s1] sm:$0xff]   ;;  %v491_v1 = vld [vmem:[%s617_s1 + $0x8] sm:$0xff]   ;;  %v492_v2 = vld [vmem:[%s617_s1 + $0x10] sm:$0xff]  }
   0x2   :  { %439 = vmatprep.subr.bf16.mxu0 %v490_v0  ;;  %471 = vmatprep.subr.bf16.mxu1 %v490_v0  ;;  %v493_v3 = vld [vmem:[%s617_s1 + $0x18] sm:$0xff]   ;;  %v498_v4 = vld [vmem:[%s616_s0] sm:$0xff]   ;;  %v495_v7 = vld [vmem:[%s617_s1 + $0x28] sm:$0xff]  }
   0x3   :  { %440 = vmatpush3.bf16.msra.mxu0 %v490_v0  ;;  %479 = vmatpush3.bf16.msra.mxu1 %v490_v0  ;;  %v499_v5 = vld [vmem:[%s616_s0 + $0x20] sm:$0xff]  }
   0x4   :  { %441 = vmatprep.subr.bf16.mxu0 %v491_v1  ;;  %472 = vmatprep.subr.bf16.mxu1 %v491_v1  ;;  %v494_v6 = vld [vmem:[%s617_s1 + $0x20] sm:$0xff]  }
   0x5   :  { %455 = vmatprep.mubr.bf16.mxu0 %v498_v4  ;;  %463 = vmatprep.mubr.bf16.mxu1 %v499_v5 }
   0x7   :  { %442 = vmatpush3.bf16.msra.mxu0 %v491_v1  ;;  %480 = vmatpush3.bf16.msra.mxu1 %v491_v1 }
   0x8   :  { %443 = vmatprep.subr.bf16.mxu0 %v492_v2  ;;  %473 = vmatprep.subr.bf16.mxu1 %v492_v2 }
   0xb   :  { %444 = vmatpush3.bf16.msra.mxu0 %v492_v2  ;;  %481 = vmatpush3.bf16.msra.mxu1 %v492_v2 }
   0xc   :  { %445 = vmatprep.subr.bf16.mxu0 %v493_v3  ;;  %474 = vmatprep.subr.bf16.mxu1 %v493_v3 }
   0xf   :  { %446 = vmatpush3.bf16.msra.mxu0 %v493_v3  ;;  %482 = vmatpush3.bf16.msra.mxu1 %v493_v3 }
  0x10   :  { %447 = vmatprep.subr.bf16.mxu0 %v494_v6  ;;  %475 = vmatprep.subr.bf16.mxu1 %v494_v6 }
  0x11   :  { %8 = vsyncpa [#allocation4], 0  ;;  %v496_v8 = vld [vmem:[%s617_s1 + $0x30] sm:$0xff]   ;;  %v497_v9 = vld [vmem:[%s617_s1 + $0x38] sm:$0xff]  }
  0x12   :  { %v500_v10 = vld [vmem:[%s616_s0 + $0x8] sm:$0xff]   ;;  %v502_v12 = vld [vmem:[%s616_s0 + $0x10] sm:$0xff]   ;;  %v504_v14 = vld [vmem:[%s616_s0 + $0x18] sm:$0xff]  }
  0x13   :  { %448 = vmatpush3.bf16.msra.mxu0 %v494_v6  ;;  %483 = vmatpush3.bf16.msra.mxu1 %v494_v6  ;;  %v501_v11 = vld [vmem:[%s616_s0 + $0x28] sm:$0xff]   ;;  %v503_v13 = vld [vmem:[%s616_s0 + $0x30] sm:$0xff]   ;;  %v505_v15 = vld [vmem:[%s616_s0 + $0x38] sm:$0xff]   ;;  %s530_s0 = smov [#allocation3]  }
  0x14   :  { %449 = vmatprep.subr.bf16.mxu0 %v495_v7  ;;  %476 = vmatprep.subr.bf16.mxu1 %v495_v7  ;;  %v422_v16 = vld [vmem:[%s618_s2] ss:$0 sm:$0xff]  ;;  %s393_s2 = sshll.u32 %s530_s0, 4  ;;  %s394_s2 = int_to_ptr.vmem [resolvable:$true] %s393_s2 }
  0x15   :  { %s506_s18 = scalar_lea.vmem %s394_s2, 2048  ;;  %p511_p1 = scmp.lt.s32.totalorder %s394_s2, %s394_s2 }
  0x16   :  { %p507_p0 = scmp.ne.s32.totalorder %s394_s2, %s506_s18  ;;  %p512_p2 = scmp.lt.s32.totalorder %s506_s18, %s506_s18 }
  0x17   :  { %450 = vmatpush3.bf16.msra.mxu0 %v495_v7  ;;  %484 = vmatpush3.bf16.msra.mxu1 %v495_v7 }
  0x18   :  { %451 = vmatprep.subr.bf16.mxu0 %v496_v8  ;;  %477 = vmatprep.subr.bf16.mxu1 %v496_v8  ;;  %p513_p3 = por %p512_p2, %p511_p1 }
  0x1a   :  { %p514_p4 = pnand %p513_p3, %p507_p0 }
  0x1b   :  { %452 = vmatpush3.bf16.msra.mxu0 %v496_v8  ;;  %485 = vmatpush3.bf16.msra.mxu1 %v496_v8 }
  0x1c   :  { %453 = vmatprep.subr.bf16.mxu0 %v497_v9  ;;  %478 = vmatprep.subr.bf16.mxu1 %v497_v9 }
  0x1f   :  { %454 = vmatpush3.bf16.msra.mxu0 %v497_v9  ;;  %486 = vmatpush3.bf16.msra.mxu1 %v497_v9 }
  0x22   :  { %456 = vmatmul.mubr.bf16.vlgmr.msra.gmra.mrb[0].mxu0 %v500_v10  ;;  %464 = vmatmul.mubr.bf16.vlgmr.msra.gmra.mrb[0].mxu1 %v501_v11 }
  0x23   :  { %459 = vmatprep.mubr.bf16.mxu0 %v502_v12  ;;  %467 = vmatprep.mubr.bf16.mxu1 %v503_v13 }
  0x2a   :  { %460 = vmatmul.mubr.bf16.gmra.mrb[4].mxu0 %v504_v14  ;;  %468 = vmatmul.mubr.bf16.gmra.mrb[4].mxu1 %v505_v15 }
  0xf5   :  { %v457_v17 = vpop.f32.mrb[0].mxu0  ;;  %v465_v18 = vpop.f32.mrb[0].mxu1 }
  0xf6   :  { %v342_v19 = vadd.f32 %v457_v17, %v422_v16  ;;  %v350_v20 = vadd.f32 %v465_v18, %v422_v16  ;;  %v219_v21 = vpop.f32.mrb[1].mxu0  ;;  %v251_v22 = vpop.f32.mrb[1].mxu1 }
  0xf7   :  { %v340_v23 = vadd.f32 %v422_v16, %v219_v21  ;;  %v348_v24 = vadd.f32 %v422_v16, %v251_v22  ;;  %v458_v25 = vpop.f32.mrb[2].mxu0  ;;  %v466_v26 = vpop.f32.mrb[2].mxu1 }
  0xf8   :  { %v358_v27 = vmax.f32 %v342_v19, 0.0  ;;  %v366_v28 = vmax.f32 %v350_v20, 0.0  ;;  %v343_v29 = vadd.f32 %v458_v25, %v422_v16  ;;  %v351_v30 = vadd.f32 %v466_v26, %v422_v16  ;;  %v222_v31 = vpop.f32.mrb[3].mxu0  ;;  %v254_v32 = vpop.f32.mrb[3].mxu1 }
  0xf9   :  { %v356_v33 = vmax.f32 %v340_v23, 0.0  ;;  %v364_v34 = vmax.f32 %v348_v24, 0.0  ;;  %v341_v35 = vadd.f32 %v422_v16, %v222_v31  ;;  %v349_v36 = vadd.f32 %v422_v16, %v254_v32 }
  0xfa   :  { %374 = vst [vmem:[#allocation3 + $0x10] sm:$0xff] %v358_v27  ;;  %382 = vst [vmem:[#allocation3 + $0x50] sm:$0xff] %v366_v28  ;;  %v359_v37 = vmax.f32 %v343_v29, 0.0  ;;  %v367_v38 = vmax.f32 %v351_v30, 0.0 }
  0xfb   :  { %372 = vst [vmem:[#allocation3] sm:$0xff] %v356_v33  ;;  %380 = vst [vmem:[#allocation3 + $0x40] sm:$0xff] %v364_v34  ;;  %v357_v39 = vmax.f32 %v341_v35, 0.0  ;;  %v365_v40 = vmax.f32 %v349_v36, 0.0 }
  0xfc   :  { %375 = vst [vmem:[#allocation3 + $0x18] sm:$0xff] %v359_v37  ;;  %383 = vst [vmem:[#allocation3 + $0x58] sm:$0xff] %v367_v38 }
  0xfd   :  { %373 = vst [vmem:[#allocation3 + $0x8] sm:$0xff] %v357_v39  ;;  %381 = vst [vmem:[#allocation3 + $0x48] sm:$0xff] %v365_v40  ;;  %v461_v41 = vpop.f32.mrb[4].mxu0  ;;  %v469_v42 = vpop.f32.mrb[4].mxu1 }
  0xfe   :  { %v346_v43 = vadd.f32 %v461_v41, %v422_v16  ;;  %v354_v44 = vadd.f32 %v469_v42, %v422_v16  ;;  %v235_v45 = vpop.f32.mrb[5].mxu0  ;;  %v267_v46 = vpop.f32.mrb[5].mxu1 }
  0xff   :  { %v344_v47 = vadd.f32 %v422_v16, %v235_v45  ;;  %v352_v48 = vadd.f32 %v422_v16, %v267_v46  ;;  %v462_v49 = vpop.f32.mrb[6].mxu0  ;;  %v470_v50 = vpop.f32.mrb[6].mxu1 }
 0x100   :  { %v362_v51 = vmax.f32 %v346_v43, 0.0  ;;  %v370_v52 = vmax.f32 %v354_v44, 0.0  ;;  %v347_v53 = vadd.f32 %v462_v49, %v422_v16  ;;  %v355_v54 = vadd.f32 %v470_v50, %v422_v16  ;;  %v238_v55 = vpop.f32.mrb[7].mxu0  ;;  %v270_v56 = vpop.f32.mrb[7].mxu1 }
 0x101   :  { %v360_v57 = vmax.f32 %v344_v47, 0.0  ;;  %v368_v58 = vmax.f32 %v352_v48, 0.0  ;;  %v345_v59 = vadd.f32 %v422_v16, %v238_v55  ;;  %v353_v60 = vadd.f32 %v422_v16, %v270_v56 }
 0x102   :  { %378 = vst [vmem:[#allocation3 + $0x30] sm:$0xff] %v362_v51  ;;  %386 = vst [vmem:[#allocation3 + $0x70] sm:$0xff] %v370_v52  ;;  %v363_v61 = vmax.f32 %v347_v53, 0.0  ;;  %v371_v62 = vmax.f32 %v355_v54, 0.0 }
 0x103   :  { %376 = vst [vmem:[#allocation3 + $0x20] sm:$0xff] %v360_v57  ;;  %384 = vst [vmem:[#allocation3 + $0x60] sm:$0xff] %v368_v58  ;;  %v361_v63 = vmax.f32 %v345_v59, 0.0  ;;  %v369_v0 = vmax.f32 %v353_v60, 0.0 }
 0x104   :  { %379 = vst [vmem:[#allocation3 + $0x38] sm:$0xff] %v363_v61  ;;  %387 = vst [vmem:[#allocation3 + $0x78] sm:$0xff] %v371_v62 }
 0x105   :  { %377 = vst [vmem:[#allocation3 + $0x28] sm:$0xff] %v361_v63  ;;  %385 = vst [vmem:[#allocation3 + $0x68] sm:$0xff] %v369_v0 }
 0x106   :  { %517 = shalt.err (!%p514_p4)
}
 0x107   :  { %s518_s21 = scalar_lea.hbm %s619_s3, 2048 }
 0x108   :  { %p519_p5 = scmp.ne.s32.totalorder %s619_s3, %s518_s21  ;;  %p522_p6 = scmp.lt.u32.totalorder %s518_s21, %s619_s3 }
 0x10a   :  { %p524_p7 = pnand %p522_p6, %p519_p5 }
 0x10c   :  { %527 = shalt.err (!%p524_p7)
}
 0x10d   :  { %s531_s26 = smov 128   ;;  %s532_s27 = smov 8  }
 0x10e   :  { %399 = dma.vmem_to_hbm [thread:$0]  %s394_s2, 2048, %s619_s3, [#allocation4], %s531_s26, %s531_s26, %s532_s27  }
 0x10f   :  { %528 = dma.done.wait [#allocation4], 2048  }
 0x110   :  { %529 = vsyncadd [#allocation4], 4294965248 }
 0x111   :  { %403 = vsyncpa [#allocation4], 1 }

</bundles_post_ra>
